<compile_context>
chip_gen: v6e
topology: v6e:2x2x1
jax: 0.10.0
libtpu: 0.0.40
codegen_flags: <defaults>
</compile_context>

<pallas_src>
import functools

import jax
import jax.numpy as jnp
from jax.experimental import pallas as pl
from jax.experimental.pallas import tpu as pltpu

LANES = 128
SUBLANES = 8
_MiB = 1024 * 1024
_MIN_BLOCK_BYTES = 1 * _MiB  # never shrink blocks below this just for pipeline depth


def _round_up(x, m):
    return ((x + m - 1) // m) * m


@functools.lru_cache(maxsize=1)
def _chip_config():
    """Per-generation block budget / scoped-VMEM cap / TensorCore count."""
    kind = ""
    try:
        kind = jax.devices()[0].device_kind.lower()
    except Exception:  # defensive: fall through to conservative defaults
        pass
    if "7" in kind:
        # v7x: 64 MiB VMEM per TensorCore, 2 TensorCores, ~3.2 TB/s HBM.
        return {"block_budget": 14 * _MiB, "vmem_cap": 48 * _MiB, "num_tc": 2}
    if "v5 lite" in kind or "v5e" in kind or "v6" in kind:
        # v5e / v6e: 128 MiB physical VMEM, 1 TensorCore.
        return {"block_budget": 20 * _MiB, "vmem_cap": 96 * _MiB, "num_tc": 1}
    # Conservative default for unknown / older generations.
    return {"block_budget": 8 * _MiB, "vmem_cap": 32 * _MiB, "num_tc": 1}


def _to_kernel(x_ref, o_ref):
    # Elementwise dtype cast on the whole VMEM tile.
    o_ref[...] = x_ref[...].astype(o_ref.dtype)


def _choose_block_rows(rows, bytes_per_row, row_align, cfg):
    """Pick block rows: budget-capped, >= 4 blocks per TC, packing-aligned."""
    if rows <= row_align:
        return rows  # single full-extent block (always a legal block shape)

    budget_rows = max(SUBLANES, cfg["block_budget"] // bytes_per_row)
    if budget_rows < row_align:
        # Very wide rows: drop to the minimal 8-row alignment so the block
        # stays inside the VMEM budget.
        row_align = SUBLANES
    block_rows = budget_rows

    # (a) At least one block per TensorCore (v7x megacore gets both TCs fed).
    if cfg["num_tc"] > 1 and rows >= cfg["num_tc"] * row_align:
        per_core = _round_up(pl.cdiv(rows, cfg["num_tc"]), row_align)
        block_rows = min(block_rows, per_core)

    # (b) >= 4 blocks per TensorCore so adjacent blocks' read / write DMAs
    #     overlap — but never shrink a block below ~1 MiB (per-grid-step
    #     overhead would dominate, and single-TC chips gain nothing).
    depth_rows = _round_up(pl.cdiv(rows, 4 * cfg["num_tc"]), row_align)
    if depth_rows * bytes_per_row >= _MIN_BLOCK_BYTES:
        block_rows = min(block_rows, depth_rows)

    # Align to the coarser sublane packing of the two dtypes so interior
    # stores are full unmasked vst.
    block_rows = max(row_align, (block_rows // row_align) * row_align)
    return min(block_rows, rows)


def _cast_blocked(x2d, target_dtype, cfg=None):
    """Cast a 2-D slab, blocking the leading dim (trailing dim full-extent)."""
    if cfg is None:
        cfg = _chip_config()
    rows, cols = x2d.shape
    in_size = jnp.dtype(x2d.dtype).itemsize
    out_size = jnp.dtype(target_dtype).itemsize
    bytes_per_row = cols * (in_size + out_size)

    # Sub-32-bit dtypes pack 2 (16-bit) or 4 (8-bit) rows per sublane.
    pack = max(max(1, 4 // in_size), max(1, 4 // out_size))
    row_align = SUBLANES * pack

    block_rows = _choose_block_rows(rows, bytes_per_row, row_align, cfg)
    grid = (pl.cdiv(rows, block_rows),)

    # Scoped-VMEM limit derived from the actual double-buffered footprint
    # (2 x (in + out) block) plus headroom, capped per generation.
    block_bytes = block_rows * bytes_per_row
    vmem_limit = int(min(cfg["vmem_cap"], max(32 * _MiB, 2 * block_bytes + 4 * _MiB)))

    # TODO(synk): pipeline_mode=pl.Buffered(3) on the input spec could help on
    # v7x when blocks end up tiny; omitted to keep the VMEM footprint minimal.
    return pl.pallas_call(
        _to_kernel,
        out_shape=jax.ShapeDtypeStruct((rows, cols), target_dtype),
        grid_spec=pl.GridSpec(
            grid=grid,
            in_specs=[pl.BlockSpec((block_rows, cols), lambda i: (i, 0))],
            out_specs=pl.BlockSpec((block_rows, cols), lambda i: (i, 0)),
        ),
        compiler_params=pltpu.CompilerParams(
            dimension_semantics=("parallel",),
            vmem_limit_bytes=vmem_limit,
        ),
    )(x2d)


def to(tensor, dtype=None, **kwargs):
    """Pallas equivalent of `tensor.to(dtype)` (dtype-cast semantics only)."""
    # TODO(synk): torch `.to()` also accepts device / memory_format /
    # non_blocking args; those have no Pallas equivalent and are ignored.
    if dtype is None:
        dtype = kwargs.get("dtype", None)
    if dtype is None:
        return tensor
    try:
        target_dtype = jnp.dtype(dtype)
    except TypeError:
        # Non-dtype positional arg (device string etc.) -> identity.
        return tensor

    if target_dtype == jnp.dtype(tensor.dtype):
        return tensor  # identity: zero HBM traffic, no kernel launch

    orig_shape = tensor.shape
    n = tensor.size
    if n == 0:
        return tensor.astype(target_dtype)

    cfg = _chip_config()
    in_size = jnp.dtype(tensor.dtype).itemsize
    out_size = jnp.dtype(target_dtype).itemsize

    if n % LANES == 0:
        # Fast path: free reshape to a lane-dense (rows, 128) slab.
        out2d = _cast_blocked(tensor.reshape(n // LANES, LANES), target_dtype, cfg)
        return out2d.reshape(orig_shape)

    # Ragged size (n % 128 != 0): block the leading dim, keep the trailing dim
    # full-extent; Pallas masks the partial boundary block, so there is no
    # pad / slice pass over HBM (~1x traffic instead of ~3x).
    if tensor.ndim >= 2:
        trail = orig_shape[-1]
        lead = n // trail
    else:
        lead, trail = 1, n
    min_block_bytes = min(lead, SUBLANES) * trail * (in_size + out_size)
    if min_block_bytes <= cfg["block_budget"]:
        out2d = _cast_blocked(tensor.reshape(lead, trail), target_dtype, cfg)
        return out2d.reshape(orig_shape)

    # Pathological ragged shape (huge non-128-multiple trailing dim): cast the
    # 128-aligned prefix through the lane-dense path and the tiny (<128 elem)
    # tail with a plain cast, then stitch.  Rarely hit; ~2x output traffic.
    flat = tensor.reshape(-1)
    n_main = (n // LANES) * LANES
    main = _cast_blocked(
        jax.lax.slice(flat, (0,), (n_main,)).reshape(n_main // LANES, LANES),
        target_dtype,
        cfg,
    ).reshape(-1)
    tail = jax.lax.slice(flat, (n_main,), (n,)).astype(target_dtype)
    return jnp.concatenate([main, tail]).reshape(orig_shape)


if __name__ == "__main__":
    key = jax.random.PRNGKey(0)
    # Small NCHW-like input consistent with a generic torch forward.
    x = jax.random.normal(key, (2, 4, 16, 16), dtype=jnp.float32)

    # Narrowing cast: f32 -> bf16 (the common `.to(torch.bfloat16)` case).
    y = jax.block_until_ready(to(x, jnp.bfloat16))
    assert y.shape == x.shape and y.dtype == jnp.bfloat16
    assert jnp.array_equal(y, x.astype(jnp.bfloat16))

    # Identity (.to() with no dtype) path: returns input as-is.
    z = jax.block_until_ready(to(x))
    assert z.dtype == x.dtype and jnp.array_equal(z, x)

    # Widening cast: bf16 -> f32.
    xb = x.astype(jnp.bfloat16)
    w = jax.block_until_ready(to(xb, jnp.float32))
    assert w.dtype == jnp.float32 and jnp.array_equal(w, xb.astype(jnp.float32))

    # Ragged size (not a multiple of 128): single-kernel masked-boundary path.
    r = jax.random.normal(jax.random.PRNGKey(1), (3, 5, 7), dtype=jnp.float32)
    rr = jax.block_until_ready(to(r, jnp.bfloat16))
    assert rr.shape == r.shape and jnp.array_equal(rr, r.astype(jnp.bfloat16))

    # Moderate aligned case that exercises the multi-block pipelined grid.
    big = jax.random.normal(jax.random.PRNGKey(2), (2048, 1024), dtype=jnp.float32)
    bb = jax.block_until_ready(to(big, jnp.bfloat16))
    assert bb.dtype == jnp.bfloat16 and jnp.array_equal(bb, big.astype(jnp.bfloat16))

    print("KERNEL_OK")
</pallas_src>

<mosaic_0001>
module attributes {stable_mosaic.version = 11 : i64} {
  func.func @_to_kernel(%arg0: i32, %arg1: memref<16x128xf32, #tpu.memory_space<vmem>>, %arg2: memref<16x128xbf16, #tpu.memory_space<vmem>>) attributes {dimension_semantics = [#tpu.dimension_semantics<parallel>], iteration_bounds = array<i64: 1>, scalar_prefetch = 0 : i64, scratch_operands = 0 : i64, tpu.core_type = #tpu.core_type<tc>, window_params = [{transform_indices = @transform_0, window_bounds = array<i64: 16, 128>}, {transform_indices = @transform_1, window_bounds = array<i64: 16, 128>}]} {
    %c0 = arith.constant 0 : index
    %c0_0 = arith.constant 0 : index
    %0 = vector.load %arg1[%c0, %c0_0] : memref<16x128xf32, #tpu.memory_space<vmem>>, vector<16x128xf32>
    %1 = arith.truncf %0 : vector<16x128xf32> to vector<16x128xbf16>
    %c0_1 = arith.constant 0 : index
    %c0_2 = arith.constant 0 : index
    %2 = vector.load %arg2[%c0_1, %c0_2] : memref<16x128xbf16, #tpu.memory_space<vmem>>, vector<16x128xbf16>
    tpu.vector_store %arg2[%c0_1, %c0_2], %1 {strides = array<i32>} : memref<16x128xbf16, #tpu.memory_space<vmem>>, vector<16x128xbf16>,
    return
  }
  func.func @transform_0(%arg0: i32) -> (i32, i32) {
    %c0_i32 = arith.constant 0 : i32
    %c0_i32_0 = arith.constant 0 : i32
    return %arg0, %c0_i32 : i32, i32
  }
  func.func @transform_1(%arg0: i32) -> (i32, i32) {
    %c0_i32 = arith.constant 0 : i32
    %c0_i32_0 = arith.constant 0 : i32
    return %arg0, %c0_i32 : i32, i32
  }
}

</mosaic_0001>

<bundles_post_ra>
// kernel: tpu_custom_call.1
= control target key start
LH: loop header
LB: loop body
LE: loop exit
PB: predicated region body
PF: predicated region fallthrough
CT: control target
= control target key end

     0   :  { %6 = vsyncpa [#allocation3], 0  ;;  %s133_s0 = inlined_call_operand.hbm [shape: f32[16,128], index: 0, kind: input, shape index: {}]   ;;  %s134_s1 = inlined_call_operand.hbm [shape: bf16[16,128], index: 1, kind: output, shape index: {}]  }
   0x1   :  { %7 = vsyncpa [#allocation4], 0  ;;  %s111_s6 = smov [#allocation2]  }
   0x2   :  { %s13_s7 = sshll.u32 %s111_s6, 4  ;;  %s14_s7 = int_to_ptr.vmem [resolvable:$true] %s13_s7 }
   0x3   :  { %s75_s8 = scalar_lea.vmem %s14_s7, 256  ;;  %p80_p1 = scmp.lt.s32.totalorder %s14_s7, %s14_s7 }
   0x4   :  { %p76_p0 = scmp.ne.s32.totalorder %s14_s7, %s75_s8  ;;  %p81_p2 = scmp.lt.s32.totalorder %s75_s8, %s75_s8 }
   0x6   :  { %p82_p3 = por %p81_p2, %p80_p1 }
   0x8   :  { %p83_p4 = pnand %p82_p3, %p76_p0 }
   0xa   :  { %86 = shalt.err (!%p83_p4)
}
   0xb   :  { %s112_s9 = smov 128   ;;  %s113_s10 = smov 8  }
   0xc   :  { %19 = dma.hbm_to_vmem [thread:$0]  %s133_s0, 256, %s14_s7, [#allocation3], %s112_s9, %s112_s9, %s113_s10  }
   0xd   :  { %107 = dma.done.wait [#allocation3], 256  }
   0xe   :  { %108 = vsyncadd [#allocation3], 4294967040  ;;  %s114_s13 = smov [#allocation5]   ;;  %v23_v0 = vld [vmem:[#allocation2] sm:$0xff]  ;;  %v24_v1 = vld [vmem:[#allocation2 + $0x8] sm:$0xff] }
   0xf   :  { %s40_s14 = sshll.u32 %s114_s13, 4  ;;  %v59_v2 = vpack.c.bf16 %v24_v1, %v23_v0  ;;  %s41_s14 = int_to_ptr.vmem [resolvable:$true] %s40_s14 }
  0x10   :  { %s87_s15 = scalar_lea.vmem %s41_s14, 128  ;;  %p92_p6 = scmp.lt.s32.totalorder %s41_s14, %s41_s14 }
  0x11   :  { %60 = vst [vmem:[#allocation5] sm:$0xff] %v59_v2   ;;  %p88_p5 = scmp.ne.s32.totalorder %s41_s14, %s87_s15  ;;  %p93_p7 = scmp.lt.s32.totalorder %s87_s15, %s87_s15 }
  0x13   :  { %p94_p8 = por %p93_p7, %p92_p6 }
  0x15   :  { %p95_p9 = pnand %p94_p8, %p88_p5 }
  0x17   :  { %98 = shalt.err (!%p95_p9)
}
  0x18   :  { %s115_s16 = smov 64   ;;  %s116_s17 = smov 4  }
  0x19   :  { %46 = dma.vmem_to_hbm [thread:$0]  %s41_s14, 128, %s134_s1, [#allocation4], %s115_s16, %s115_s16, %s116_s17  }
  0x1a   :  { %109 = dma.done.wait [#allocation4], 128  }
  0x1b   :  { %110 = vsyncadd [#allocation4], 4294967168 }
  0x1c   :  { %50 = vsyncpa [#allocation3], 1 }
  0x1d   :  { %51 = vsyncpa [#allocation4], 1 }

</bundles_post_ra>
